<compile_context>
chip_gen: v7x
topology: tpu7x:2x2x1
jax: 0.10.0
libtpu: 0.0.40
codegen_flags: <defaults>
</compile_context>

<pallas_src>
import functools

import jax
import jax.numpy as jnp
from jax.experimental import pallas as pl
from jax.experimental.pallas import tpu as pltpu

_LANE = 128
_SUBLANE = 8


def _round_up(x: int, m: int) -> int:
    return ((x + m - 1) // m) * m


def _tpu_vmem_capacity_bytes() -> int:
    """Physical VMEM of the current chip (falls back to a v7x-safe 64 MiB)."""
    try:
        return int(pltpu.get_tpu_info().vmem_capacity_bytes)
    except Exception:
        return 64 << 20


def context_block_kernel(x_ref, w1_ref, b1_ref, w2_ref, b2_ref, o_ref):
    # x_ref : (TM, in_features)                -- batch tile (auto double-buffered)
    # w1_ref: (in_features, out_pad)           -- VMEM-resident (constant index_map)
    # b1_ref: (1, out_pad)
    # w2_ref: (out_pad, out_pad)               -- VMEM-resident (constant index_map)
    # b2_ref: (1, out_pad)
    # o_ref : (TM, out_store)  where out_store is out_features (unpadded store) or out_pad
    x = x_ref[...]
    if x.dtype != w1_ref.dtype:
        # Cast the O(tile) activations, never the O(weights) resident blocks.
        x = x.astype(w1_ref.dtype)

    # Linear 1 + ReLU: native-dtype operands on the MXU, f32 accumulate / bias / ReLU.
    h = jnp.dot(x, w1_ref[...], preferred_element_type=jnp.float32)
    h = jnp.maximum(h + b1_ref[...].astype(jnp.float32), 0.0)

    # Linear 2: keep bf16 weights on the fast MXU path (no-op cast for f32 params).
    h = h.astype(w2_ref.dtype)
    y = jnp.dot(h, w2_ref[...], preferred_element_type=jnp.float32)
    y = y + b2_ref[...].astype(jnp.float32)

    # Drop the padded lanes before the store when the output block is unpadded.
    o_ref[...] = y[:, : o_ref.shape[-1]].astype(o_ref.dtype)


def prepare_params(w1, b1, w2, b2):
    """Pad the out-feature axis to a lane multiple ONCE, outside any jit/forward call.

    w1: (in, out), w2: (out, out); biases (out,) or (1, out).
    Returns (w1p, b1p, w2p, b2p, out_features).
    """
    in_features, out_features = w1.shape
    out_pad = _round_up(out_features, _LANE)
    pad = out_pad - out_features
    b1 = b1.reshape(1, -1)
    b2 = b2.reshape(1, -1)
    if pad:
        w1 = jnp.pad(w1, ((0, 0), (0, pad)))
        b1 = jnp.pad(b1, ((0, 0), (0, pad)))
        w2 = jnp.pad(w2, ((0, pad), (0, pad)))
        b2 = jnp.pad(b2, ((0, 0), (0, pad)))
    return w1, b1, w2, b2, out_features


@functools.partial(jax.jit, static_argnames=("out_features", "tm", "force_pallas"))
def context_block_forward(x, w1p, b1p, w2p, b2p, *, out_features, tm=None,
                          force_pallas=False):
    """Pallas implementation of ContextBlock.forward.

    x may have any leading shape; it is flattened to (-1, in_features) exactly like
    `input.view(-1, self.in_features)`.  Params must come from prepare_params().
    Returns an array of shape (B, out_features, 1, 1).
    """
    in_features, out_pad = w1p.shape
    x2d = x.reshape(-1, in_features)
    batch = x2d.shape[0]
    out_dtype = x2d.dtype

    # --- Tiny-problem fast path: launch/grid overhead would dwarf the work ----------
    if not force_pallas and batch * out_pad <= 4096:
        h = jnp.maximum(x2d @ w1p + b1p, 0.0)
        y = (h @ w2p + b2p)[:, :out_features]
        return y.astype(out_dtype).reshape(batch, out_features, 1, 1)

    # --- Output store width: unpadded when padding dominates ------------------------
    pad = out_pad - out_features
    out_store = out_features if pad > out_features else out_pad

    # --- VMEM budgeting (per chip generation) ---------------------------------------
    x_itemsize = jnp.dtype(x2d.dtype).itemsize
    w_itemsize = jnp.dtype(w1p.dtype).itemsize

    weight_bytes = (w1p.size + b1p.size + w2p.size + b2p.size) * w_itemsize
    # Pallas double-buffers even constant-index blocks by default.
    # TODO(synk): pipeline_mode=pl.Buffered(1) on the constant weight specs would halve
    # this footprint (matters for large out_features on v7x's 64 MiB VMEM).
    resident_bytes = 2 * weight_bytes

    vmem_cap = _tpu_vmem_capacity_bytes()
    vmem_budget = min(vmem_cap * 3 // 4, 100 << 20)  # ~48 MiB v7x, ~96 MiB v5e/v6e

    # One x row + one output row, both double-buffered by the pipeline.
    row_bytes = (in_features + out_store) * x_itemsize
    tile_budget = max(vmem_budget - resident_bytes, 1 << 20)
    tm_cap = max(8, min(4096, (tile_budget // (2 * row_bytes)) // _SUBLANE * _SUBLANE))

    if tm is None:
        tm = _round_up(batch, _SUBLANE)
    tm = max(_SUBLANE, min(_round_up(tm, _SUBLANE), tm_cap))

    # Keep >= 2 grid steps when the batch allows so the "parallel" batch axis can be
    # sharded across v7x's two TensorCores (harmless no-op on single-core v5e/v6e).
    if batch > _SUBLANE and pl.cdiv(batch, tm) == 1:
        tm = max(_SUBLANE, _round_up(pl.cdiv(batch, 2), _SUBLANE))

    grid = (pl.cdiv(batch, tm),)

    need_bytes = resident_bytes + 2 * tm * row_bytes + (2 << 20)
    vmem_limit = int(min(vmem_cap, max(need_bytes, 16 << 20)))
    # TODO(synk): add an N-tiled (and if needed K-tiled) weight path once the resident
    # w2 slab alone no longer fits the budget (~2.4k f32 out_features on v7x), instead
    # of relying on vmem_limit clamping.

    cost = pl.CostEstimate(
        flops=2 * batch * (in_features * out_pad + out_pad * out_pad),
        transcendentals=0,
        bytes_accessed=(x2d.size * x_itemsize
                        + weight_bytes
                        + batch * out_store * x_itemsize),
    )

    out2d = pl.pallas_call(
        context_block_kernel,
        out_shape=jax.ShapeDtypeStruct((batch, out_store), out_dtype),
        grid_spec=pl.GridSpec(
            grid=grid,
            in_specs=[
                pl.BlockSpec((tm, in_features), lambda i: (i, 0)),       # x: batch-tiled
                pl.BlockSpec((in_features, out_pad), lambda i: (0, 0)),  # w1: resident
                pl.BlockSpec((1, out_pad), lambda i: (0, 0)),            # b1: resident
                pl.BlockSpec((out_pad, out_pad), lambda i: (0, 0)),      # w2: resident
                pl.BlockSpec((1, out_pad), lambda i: (0, 0)),            # b2: resident
            ],
            out_specs=pl.BlockSpec((tm, out_store), lambda i: (i, 0)),
        ),
        compiler_params=pltpu.CompilerParams(
            dimension_semantics=("parallel",),
            vmem_limit_bytes=vmem_limit,
        ),
        cost_estimate=cost,
    )(x2d, w1p, b1p, w2p, b2p)

    if out_store > out_features:
        out2d = out2d[:, :out_features]
    return out2d.reshape(batch, out_features, 1, 1)


def init_params(key, in_features, out_features, dtype=jnp.float32):
    """Deterministic synthetic parameters (PyTorch Linear init ranges, transposed layout)."""
    k1, k2, k3, k4 = jax.random.split(key, 4)
    bound1 = 1.0 / (in_features ** 0.5)
    bound2 = 1.0 / (out_features ** 0.5)
    w1 = jax.random.uniform(k1, (in_features, out_features), dtype, -bound1, bound1)
    b1 = jax.random.uniform(k2, (1, out_features), dtype, -bound1, bound1)
    w2 = jax.random.uniform(k3, (out_features, out_features), dtype, -bound2, bound2)
    b2 = jax.random.uniform(k4, (1, out_features), dtype, -bound2, bound2)
    return w1, b1, w2, b2


if __name__ == "__main__":
    key = jax.random.PRNGKey(0)
    kx, kx2, kp = jax.random.split(key, 3)

    in_features = 8
    out_features = 32

    # Raw (PyTorch-like, transposed) params, padded once at "load time".
    w1, b1, w2, b2 = init_params(kp, in_features, out_features)
    w1p, b1p, w2p, b2p, out_f = prepare_params(w1, b1, w2, b2)

    def reference(xin):
        h = jnp.maximum(xin.reshape(-1, in_features) @ w1 + b1, 0.0)
        return (h @ w2 + b2).reshape(-1, out_features, 1, 1)

    # 1) Pallas path (context/timestep embeddings for a batch of images).
    batch = 64
    x = jax.random.normal(kx, (batch, in_features), dtype=jnp.float32)
    out = context_block_forward(x, w1p, b1p, w2p, b2p,
                                out_features=out_f, force_pallas=True)
    out = jax.block_until_ready(out)
    assert out.shape == (batch, out_features, 1, 1)
    assert jnp.allclose(out, reference(x), atol=1e-5, rtol=1e-5)

    # 2) Tiny-problem fast path (same math, fused by XLA instead of pallas_call).
    x_small = jax.random.normal(kx2, (2, in_features), dtype=jnp.float32)
    out_small = jax.block_until_ready(
        context_block_forward(x_small, w1p, b1p, w2p, b2p, out_features=out_f))
    assert out_small.shape == (2, out_features, 1, 1)
    assert jnp.allclose(out_small, reference(x_small), atol=1e-5, rtol=1e-5)

    print("KERNEL_OK")
</pallas_src>

<mosaic_0001>
module attributes {stable_mosaic.version = 11 : i64} {
  func.func @context_block_kernel(%arg0: i32, %arg1: memref<32x8xf32, #tpu.memory_space<vmem>>, %arg2: memref<8x128xf32, #tpu.memory_space<vmem>>, %arg3: memref<1x128xf32, #tpu.memory_space<vmem>>, %arg4: memref<128x128xf32, #tpu.memory_space<vmem>>, %arg5: memref<1x128xf32, #tpu.memory_space<vmem>>, %arg6: memref<32x32xf32, #tpu.memory_space<vmem>>) attributes {dimension_semantics = [#tpu.dimension_semantics<parallel>], iteration_bounds = array<i64: 2>, scalar_prefetch = 0 : i64, scratch_operands = 0 : i64, tpu.core_type = #tpu.core_type<tc>, window_params = [{transform_indices = @transform_0, window_bounds = array<i64: 32, 8>}, {pipeline_mode = #tpu.pipeline_mode<synchronous>, transform_indices = @transform_1, window_bounds = array<i64: 8, 128>}, {pipeline_mode = #tpu.pipeline_mode<synchronous>, transform_indices = @transform_2, window_bounds = array<i64: 1, 128>}, {pipeline_mode = #tpu.pipeline_mode<synchronous>, transform_indices = @transform_3, window_bounds = array<i64: 128, 128>}, {pipeline_mode = #tpu.pipeline_mode<synchronous>, transform_indices = @transform_4, window_bounds = array<i64: 1, 128>}, {transform_indices = @transform_5, window_bounds = array<i64: 32, 32>}]} {
    %c0 = arith.constant 0 : index
    %c0_0 = arith.constant 0 : index
    %0 = vector.load %arg1[%c0, %c0_0] : memref<32x8xf32, #tpu.memory_space<vmem>>, vector<32x8xf32>
    %c0_1 = arith.constant 0 : index
    %c0_2 = arith.constant 0 : index
    %1 = vector.load %arg2[%c0_1, %c0_2] : memref<8x128xf32, #tpu.memory_space<vmem>>, vector<8x128xf32>
    %cst = arith.constant dense<0.000000e+00> : vector<32x128xf32>
    %2 = tpu.matmul %0, %1, %cst {dimension_numbers = #tpu.dot_dimension_numbers<[1], [0], [0], [1], [0, 0, 1, 1], [], []>} : vector<32x8xf32>, vector<8x128xf32>, vector<32x128xf32> -> vector<32x128xf32>
    %c0_3 = arith.constant 0 : index
    %c0_4 = arith.constant 0 : index
    %3 = vector.load %arg3[%c0_3, %c0_4] : memref<1x128xf32, #tpu.memory_space<vmem>>, vector<1x128xf32>
    %4 = vector.broadcast %3 : vector<1x128xf32> to vector<32x128xf32>
    %5 = arith.addf %2, %4 : vector<32x128xf32>
    %cst_5 = arith.constant 0.000000e+00 : f32
    %6 = vector.broadcast %cst_5 : f32 to vector<32x128xf32>
    %7 = arith.maximumf %5, %6 : vector<32x128xf32>
    %c0_6 = arith.constant 0 : index
    %c0_7 = arith.constant 0 : index
    %8 = vector.load %arg4[%c0_6, %c0_7] : memref<128x128xf32, #tpu.memory_space<vmem>>, vector<128x128xf32>
    %cst_8 = arith.constant dense<0.000000e+00> : vector<32x128xf32>
    %9 = tpu.matmul %7, %8, %cst_8 {dimension_numbers = #tpu.dot_dimension_numbers<[1], [0], [0], [1], [0, 0, 1, 1], [], []>} : vector<32x128xf32>, vector<128x128xf32>, vector<32x128xf32> -> vector<32x128xf32>
    %c0_9 = arith.constant 0 : index
    %c0_10 = arith.constant 0 : index
    %10 = vector.load %arg5[%c0_9, %c0_10] : memref<1x128xf32, #tpu.memory_space<vmem>>, vector<1x128xf32>
    %11 = vector.broadcast %10 : vector<1x128xf32> to vector<32x128xf32>
    %12 = arith.addf %9, %11 : vector<32x128xf32>
    %13 = vector.extract_strided_slice %12 {offsets = [0, 0], sizes = [32, 32], strides = [1, 1]} : vector<32x128xf32> to vector<32x32xf32>
    %c0_11 = arith.constant 0 : index
    %c0_12 = arith.constant 0 : index
    %14 = vector.load %arg6[%c0_11, %c0_12] : memref<32x32xf32, #tpu.memory_space<vmem>>, vector<32x32xf32>
    tpu.vector_store %arg6[%c0_11, %c0_12], %13 {strides = array<i32>} : memref<32x32xf32, #tpu.memory_space<vmem>>, vector<32x32xf32>,
    return
  }
  func.func @transform_0(%arg0: i32) -> (i32, i32) {
    %c0_i32 = arith.constant 0 : i32
    %c0_i32_0 = arith.constant 0 : i32
    return %arg0, %c0_i32 : i32, i32
  }
  func.func @transform_1(%arg0: i32) -> (i32, i32) {
    %c0_i32 = arith.constant 0 : i32
    %c0_i32_0 = arith.constant 0 : i32
    %c0_i32_1 = arith.constant 0 : i32
    return %c0_i32, %c0_i32_0 : i32, i32
  }
  func.func @transform_2(%arg0: i32) -> (i32, i32) {
    %c0_i32 = arith.constant 0 : i32
    %c0_i32_0 = arith.constant 0 : i32
    %c0_i32_1 = arith.constant 0 : i32
    return %c0_i32, %c0_i32_0 : i32, i32
  }
  func.func @transform_3(%arg0: i32) -> (i32, i32) {
    %c0_i32 = arith.constant 0 : i32
    %c0_i32_0 = arith.constant 0 : i32
    %c0_i32_1 = arith.constant 0 : i32
    return %c0_i32, %c0_i32_0 : i32, i32
  }
  func.func @transform_4(%arg0: i32) -> (i32, i32) {
    %c0_i32 = arith.constant 0 : i32
    %c0_i32_0 = arith.constant 0 : i32
    %c0_i32_1 = arith.constant 0 : i32
    return %c0_i32, %c0_i32_0 : i32, i32
  }
  func.func @transform_5(%arg0: i32) -> (i32, i32) {
    %c0_i32 = arith.constant 0 : i32
    %c0_i32_0 = arith.constant 0 : i32
    return %arg0, %c0_i32 : i32, i32
  }
}

</mosaic_0001>

<bundles_post_ra>
// kernel: context_block_forward.1
= control target key start
LH: loop header
LB: loop body
LE: loop exit
PB: predicated region body
PF: predicated region fallthrough
CT: control target
= control target key end

     0   :  { %10 = vsyncpa [#allocation3], 0  ;;  %s770_s18 = smov 0   ;;  %s849_s0 = inlined_call_operand.vmem [shape: f32[64,8], index: 0, kind: input, shape index: {}]   ;;  %s850_s1 = inlined_call_operand.vmem [shape: f32[8,128], index: 1, kind: input, shape index: {}]   ;;  %s851_s2 = inlined_call_operand.vmem [shape: f32[1,128], index: 2, kind: input, shape index: {}]   ;;  %s852_s3 = inlined_call_operand.hbm [shape: f32[128,128], index: 3, kind: input, shape index: {}]   ;;  %s853_s4 = inlined_call_operand.vmem [shape: f32[1,128], index: 4, kind: input, shape index: {}]   ;;  %s854_s5 = inlined_call_operand.vmem [shape: f32[64,32], index: 5, kind: output, shape index: {}]  }
   0x1 LB: > { %s538_s19 = sadd.s32 4294967295, %s735_s18   ;;  %p540_p0 = scmp.ge.s32.totalorder %s735_s18, 1  ;;  %s735_s18 = sphi %s770_s18, %s16_s18  }
   0x2   : > { %p157_p1 = scmp.lt.s32.totalorder %s735_s18, 3  ;;  %s737_s20 = smov [#allocation2]  }
   0x3   : > { %s175_s21 = sshll.u32 %s737_s20, 4  ;;  %p784_p3 = scmp.eq.s32.totalorder %s538_s19, 0  ;;  %s176_s21 = int_to_ptr.vmem [resolvable:$true] %s175_s21 }
   0x4   : > { %p778_p2 = pnand %p540_p0, %p157_p1  ;;  %s697_s27 = scalar_lea.hbm %s852_s3, 2048 }
   0x5   : > { %s859_s23 = scalar_select %p784_p3, 1, 0 }
   0x6   : > { %s858_s22 = scalar_select %p778_p2, 1, 0 }
   0x7   : > { %p680_p4 = pneg %p778_p2  ;;  %p698_p6 = scmp.ne.s32.totalorder %s852_s3, %s697_s27 }
   0x8   : > { %p704_p10 = scmp.lt.u32.totalorder %s697_s27, %s852_s3 }
   0x9   : > { %p792_p5 = pnand %p784_p3, %p680_p4 }
   0xb   : > { %p699_p7 = pneg %p792_p5 }
   0xd   : > { %p700_p8 = pnand %p699_p7, %p698_p6 }
   0xf   : > { %p701_p9 = pneg %p700_p8 }
  0x11   : > { %p706_p11 = pnand %p704_p10, %p701_p9 }
  0x13   : > { %709 = shalt.err (!%p706_p11)
}
  0x14   : > { %s710_s7 = scalar_lea.vmem %s176_s21, 2048  ;;  %p718_p1 = scmp.lt.s32.totalorder %s176_s21, %s176_s21 }
  0x15   : > { %p711_p12 = scmp.ne.s32.totalorder %s176_s21, %s710_s7  ;;  %p719_p4 = scmp.lt.s32.totalorder %s710_s7, %s710_s7 }
  0x17   : > { %p713_p13 = pnand %p711_p12, %p699_p7  ;;  %p720_p3 = por %p719_p4, %p718_p1 }
  0x19   : > { %p714_p0 = pneg %p713_p13 }
  0x1b   : > { %p721_p2 = pnand %p720_p3, %p714_p0 }
  0x1d   : > { %724 = shalt.err (!%p721_p2)
}
  0x1e   : > { %s738_s8 = smov 128   ;;  %s739_s9 = smov 8  }
  0x1f   : > { %683 = dma.hbm_to_vmem [thread:$0]  (!%p792_p5), %s852_s3, 2048, %s176_s21, [#allocation3], %s738_s8, %s738_s8, %s739_s9  }
  0x20   : > { %p861_p6 = scmp.ne.s32.totalorder %s858_s22, 0 }
  0x21   : > { %p862_p8 = scmp.ne.s32.totalorder (!%p861_p6), %s859_s23, 0 }
  0x22   : > { %203 = sbr.rel (%p861_p6) target bundleno = 488 (0x1e8), region = 40 }
  0x29   : > { %730 = dma.done.wait (%p862_p8), [#allocation3], 2048  }
  0x2a   : > { %732 = vsyncadd (%p862_p8), [#allocation3], 4294965248  ;;  %s545_s12 = sshll.u32 %s538_s19, 2  ;;  %vm255_vm0 = vcmask 64512   ;;  %v247_v0 = vld [vmem:[%s850_s1] sm:$0xff]  ;;  %v358_v5 = vld [vmem:[#allocation2 + $0x8] sm:$0xff] }
  0x2b   : > { %p232_p2 = scmp.lt.s32.totalorder %s545_s12, 7  ;;  %582 = vmatprep.subr.mxu0 %v247_v0  ;;  %v357_v4 = vld [vmem:[#allocation2] sm:$0xff]  ;;  %v359_v6 = vld [vmem:[#allocation2 + $0x10] sm:$0xff]  ;;  %v360_v7 = vld [vmem:[#allocation2 + $0x18] sm:$0xff]  ;;  %vm465_vm1 = vcmask 261120  }
  0x2c   : > { %583 = vmatpush3.msra.mxu0 %v247_v0  ;;  %v628_v8 = vpack.c.bf16 %v358_v5, %v357_v4  ;;  %v632_v9 = vpack.c.bf16 %v360_v7, %v359_v6  ;;  %v361_v11 = vld [vmem:[#allocation2 + $0x20] sm:$0xff]  ;;  %v362_v12 = vld [vmem:[#allocation2 + $0x28] sm:$0xff]  ;;  %v363_v14 = vld [vmem:[#allocation2 + $0x30] sm:$0xff] }
  0x2d   : > { %s864_s12 = smov (!%p232_p2, %s545_s12), 7  ;;  %v636_v13 = vpack.c.bf16 %v362_v12, %v361_v11  ;;  %v364_v15 = vld [vmem:[#allocation2 + $0x38] sm:$0xff]  ;;  %v365_v17 = vld [vmem:[#allocation2 + $0x40] sm:$0xff]  ;;  %v366_v18 = vld [vmem:[#allocation2 + $0x48] sm:$0xff] }
  0x2e   : > { %s546_s13 = sshll.u32 %s864_s12, 3  ;;  %629 = vmatprep.subr.bf16.mxu0 %v628_v8  ;;  %660 = vmatprep.subr.bf16.mxu1 %v628_v8  ;;  %v640_v16 = vpack.c.bf16 %v364_v15, %v363_v14  ;;  %v644_v19 = vpack.c.bf16 %v366_v18, %v365_v17  ;;  %v367_v20 = vld [vmem:[#allocation2 + $0x50] sm:$0xff]  ;;  %v368_v21 = vld [vmem:[#allocation2 + $0x58] sm:$0xff]  ;;  %v369_v23 = vld [vmem:[#allocation2 + $0x60] sm:$0xff] }
  0x2f   : > { %s235_s16 = scalar_lea.vmem %s849_s0, %s546_s13  ;;  %668 = vmatpush3.bf16.msra.mxu1 %v628_v8  ;;  %v648_v22 = vpack.c.bf16 %v368_v21, %v367_v20  ;;  %v370_v24 = vld [vmem:[#allocation2 + $0x68] sm:$0xff]  ;;  %v371_v26 = vld [vmem:[#allocation2 + $0x70] sm:$0xff]  ;;  %v372_v27 = vld [vmem:[#allocation2 + $0x78] sm:$0xff]  ;;  %s241_s26 = scalar_lea.vmem %s854_s5, %s546_s13 }
  0x30   : > { %v243_v1 = vld [vmem:[%s235_s16] sm:$0xff]  ;;  %v244_v2 = vld [vmem:[%s235_s16 + $0x8] sm:$0xff]  ;;  %v245_v3 = vld [vmem:[%s235_s16 + $0x10] sm:$0xff]  ;;  %661 = vmatprep.subr.bf16.mxu1 %v632_v9  ;;  %v652_v25 = vpack.c.bf16 %v370_v24, %v369_v23  ;;  %v656_v28 = vpack.c.bf16 %v372_v27, %v371_v26 }
  0x31   : > { %584 = vmatprep.mubr.msk.f32.mxu0 %vm255_vm0, %v243_v1  ;;  %v246_v10 = vld [vmem:[%s235_s16 + $0x18] sm:$0xff]  ;;  %v549_v29 = vld [vmem:[%s851_s2] ss:$0 sm:$0xff] }
  0x32   : > { %585 = vmatmul.mubr.msk.f32.vlgmr.msra.gmra.mrb[0].mxu0 %vm255_vm0, %v244_v2  ;;  %v554_v42 = vld [vmem:[%s853_s4] ss:$0 sm:$0xff] }
  0x33   : > { %587 = vmatprep.mubr.msk.f32.mxu0 %vm255_vm0, %v245_v3  ;;  %631 = vmatpush3.bf16.msra.mxu0 %v628_v8 }
  0x34   : > { %633 = vmatprep.subr.bf16.mxu0 %v632_v9  ;;  %669 = vmatpush3.bf16.msra.mxu1 %v632_v9 }
  0x35   : > { %662 = vmatprep.subr.bf16.mxu1 %v636_v13 }
  0x36   : > { %588 = vmatmul.mubr.msk.f32.gmra.mrb[2].mxu0 %vm255_vm0, %v246_v10 }
  0x37   : > { %635 = vmatpush3.bf16.msra.mxu0 %v632_v9 }
  0x38   : > { %637 = vmatprep.subr.bf16.mxu0 %v636_v13  ;;  %670 = vmatpush3.bf16.msra.mxu1 %v636_v13 }
  0x39   : > { %663 = vmatprep.subr.bf16.mxu1 %v640_v16 }
  0x3b   : > { %639 = vmatpush3.bf16.msra.mxu0 %v636_v13 }
  0x3c   : > { %641 = vmatprep.subr.bf16.mxu0 %v640_v16  ;;  %671 = vmatpush3.bf16.msra.mxu1 %v640_v16 }
  0x3d   : > { %664 = vmatprep.subr.bf16.mxu1 %v644_v19 }
  0x3f   : > { %643 = vmatpush3.bf16.msra.mxu0 %v640_v16 }
  0x40   : > { %645 = vmatprep.subr.bf16.mxu0 %v644_v19  ;;  %672 = vmatpush3.bf16.msra.mxu1 %v644_v19 }
  0x41   : > { %665 = vmatprep.subr.bf16.mxu1 %v648_v22 }
  0x43   : > { %647 = vmatpush3.bf16.msra.mxu0 %v644_v19 }
  0x44   : > { %649 = vmatprep.subr.bf16.mxu0 %v648_v22  ;;  %673 = vmatpush3.bf16.msra.mxu1 %v648_v22 }
  0x45   : > { %666 = vmatprep.subr.bf16.mxu1 %v652_v25 }
  0x47   : > { %651 = vmatpush3.bf16.msra.mxu0 %v648_v22 }
  0x48   : > { %653 = vmatprep.subr.bf16.mxu0 %v652_v25  ;;  %674 = vmatpush3.bf16.msra.mxu1 %v652_v25 }
  0x49   : > { %667 = vmatprep.subr.bf16.mxu1 %v656_v28 }
  0x4b   : > { %655 = vmatpush3.bf16.msra.mxu0 %v652_v25 }
  0x4c   : > { %657 = vmatprep.subr.bf16.mxu0 %v656_v28  ;;  %675 = vmatpush3.bf16.msra.mxu1 %v656_v28 }
  0x4f   : > { %659 = vmatpush3.bf16.msra.mxu0 %v656_v28 }
 0x105   : > { %v586_v30 = vpop.f32.mrb[0].mxu0 }
 0x106   : > { %v340_v31 = vadd.f32 %v586_v30, %v549_v29  ;;  %v334_v32 = vpop.f32.mrb[1].mxu0 }
 0x107   : > { %v335_v33 = vadd.f32 %v549_v29, %v334_v32 }
 0x108   : > { %v354_v36 = vmax.f32 %v340_v31, 0.0 }
 0x109   : > { %v353_v34 = vmax.f32 %v335_v33, 0.0  ;;  %v589_v35 = vpop.f32.mrb[2].mxu0 }
 0x10a   : > { %v350_v37 = vadd.f32 %v589_v35, %v549_v29  ;;  %v344_v38 = vpop.f32.mrb[3].mxu0 }
 0x10b   : > { %622 = vmatprep.mubr.f32.mxu0 %v353_v34  ;;  %v345_v39 = vadd.f32 %v549_v29, %v344_v38 }
 0x10c   : > { %623 = vmatmul.mubr.f32.vlgmr.msra.gmra.mrb[4].mxu0 %v354_v36  ;;  %v356_v41 = vmax.f32 %v350_v37, 0.0 }
 0x10d   : > { %v355_v40 = vmax.f32 %v345_v39, 0.0 }
 0x10f   : > { %625 = vmatprep.mubr.f32.mxu1 %v355_v40 }
 0x110   : > { %626 = vmatmul.mubr.f32.vlgmr.msra.gmra.mrb[0].mxu1 %v356_v41 }
 0x1df   : > { %v624_v43 = vpop.f32.mrb[4].mxu0 }
 0x1e0   : > { %v446_v44 = vpop.f32.mrb[5].mxu0  ;;  %v452_v46 = vadd.f32 %v624_v43, %v554_v42 }
 0x1e1   : > { %v447_v45 = vadd.f32 %v554_v42, %v446_v44 }
 0x1e2   : > { %467 = vst.msk [vmem:[%s241_s26 + $0x8] sm:$0xff] %vm465_vm1, %v452_v46 }
 0x1e3   : > { %466 = vst.msk [vmem:[%s241_s26] sm:$0xff] %vm465_vm1, %v447_v45  ;;  %v627_v47 = vpop.f32.mrb[0].mxu1 }
 0x1e4   : > { %v456_v48 = vpop.f32.mrb[1].mxu1  ;;  %v462_v50 = vadd.f32 %v627_v47, %v554_v42 }
 0x1e5   : > { %v457_v49 = vadd.f32 %v554_v42, %v456_v48 }
 0x1e6   : > { %469 = vst.msk [vmem:[%s241_s26 + $0x18] sm:$0xff] %vm465_vm1, %v462_v50 }
 0x1e7   : > { %468 = vst.msk [vmem:[%s241_s26 + $0x10] sm:$0xff] %vm465_vm1, %v457_v49 }
 0x1e8 PF: > { %s16_s18 = sadd.s32 1, %s735_s18  }
 0x1e9   : > { %p13_p3 = scmp.ge.s32.totalorder %s16_s18, 4  }
 0x1eb   :  { %15 = sbr.rel (!%p13_p3) target bundleno = 1 (0x1), region = 75 }
 0x1f2   :  { %492 = vsyncpa [#allocation3], 1 }
 0x1f3   :  { %494 = vsyncpa [#allocation3 + $0x1], 1 }

</bundles_post_ra>
